<compile_context>
chip_gen: v5e
topology: v5e:2x2
jax: 0.10.0
libtpu: 0.0.40
codegen_flags: <defaults>
</compile_context>

<pallas_src>
import functools

import jax
import jax.numpy as jnp
from jax import lax
from jax.experimental import pallas as pl
from jax.experimental.pallas import tpu as pltpu


def _fused_dense_block_kernel(p_ref, w1_ref, b1_ref, g1_ref, be1_ref,
                              w2_ref, b2_ref, g2_ref, be2_ref, o_ref,
                              *, inv_count, eps):
    """Whole DenseBlock_light forward for the full batch in one kernel.

    p_ref  : (Kp, N*HW)   bf16  zero-padded im2col patches (reflect-padded)
    w1_ref : (C_mid, Kp)  bf16  im2col-packed 3x3 conv weight (zero-padded K)
    b1/g1/be1 : (C_mid,1) f32   conv1 bias, BN1 gamma, BN1 beta
    w2_ref : (C_out, C_mid) bf16  1x1 conv weight
    b2/g2/be2 : (C_out,1) f32   conv2 bias, BN2 gamma, BN2 beta
    o_ref  : (C_out, N*HW) f32  final BN2+ReLU output (channels on sublanes,
                                batch*pixels on lanes -> lane-dense stores)
    """
    # ---- layer 1: 3x3 conv as ONE K-padded GEMM, f32 accumulation ----------
    y1 = jnp.dot(w1_ref[...], p_ref[...],
                 preferred_element_type=jnp.float32)           # (C_mid, N*HW)
    y1 = y1 + b1_ref[...]

    # ---- BN1 (training-mode batch stats) + ReLU ----------------------------
    # Two-pass centered variance: cheap on VMEM-resident data, avoids the
    # E[x^2] - mean^2 cancellation.  rsqrt goes to the EUP (free slot).
    mean1 = jnp.sum(y1, axis=1, keepdims=True) * inv_count
    d1 = y1 - mean1
    var1 = jnp.sum(d1 * d1, axis=1, keepdims=True) * inv_count
    a1 = jnp.maximum(
        d1 * (g1_ref[...] * lax.rsqrt(var1 + eps)) + be1_ref[...], 0.0)

    # ---- layer 2: 1x1 conv as a GEMM (bf16 operands, f32 accumulate) -------
    y2 = jnp.dot(w2_ref[...], a1.astype(jnp.bfloat16),
                 preferred_element_type=jnp.float32)           # (C_out, N*HW)
    y2 = y2 + b2_ref[...]

    # ---- BN2 + ReLU ---------------------------------------------------------
    mean2 = jnp.sum(y2, axis=1, keepdims=True) * inv_count
    d2 = y2 - mean2
    var2 = jnp.sum(d2 * d2, axis=1, keepdims=True) * inv_count
    o_ref[...] = jnp.maximum(
        d2 * (g2_ref[...] * lax.rsqrt(var2 + eps)) + be2_ref[...], 0.0)


@functools.partial(jax.jit, static_argnames=("eps",))
def dense_block_light(x, w1, b1, g1, be1, w2, b2, g2, be2, eps=1e-5):
    """Forward pass of DenseBlock_light.

    x : (N, C_in, H, W) f32 (NCHW, like PyTorch); returns (N, C_out, H, W) f32.
    w1: (C_mid, C_in, 3, 3), b1: (C_mid,)   -- layer-1 conv (C_mid = C_in // 2)
    g1, be1: (C_mid,)                        -- layer-1 BN gamma / beta
    w2: (C_out, C_mid, 1, 1), b2: (C_out,)  -- layer-2 conv
    g2, be2: (C_out,)                        -- layer-2 BN gamma / beta
    """
    N, C_in, H, W = x.shape
    C_mid = w1.shape[0]
    C_out = w2.shape[0]
    HW = H * W
    NHW = N * HW
    K = 9 * C_in
    Kp = max(128, -(-K // 128) * 128)        # pad contraction depth to >=128

    # ---- wrapper layout prep: channels-first im2col straight from NCHW -----
    # (no NHWC lane transpose of the activation).  Row index of a patch is
    # (kh*3 + kw)*C_in + c, matching the packed weight below.
    x_pad = jnp.pad(x.astype(jnp.float32),
                    ((0, 0), (0, 0), (1, 1), (1, 1)), mode="reflect")
    taps = [x_pad[:, :, kh:kh + H, kw:kw + W]
            for kh in range(3) for kw in range(3)]
    patches = jnp.concatenate(taps, axis=1).reshape(N, K, HW)    # (N, 9C, HW)
    # Fold batch onto the lane axis: leading-axis permutation only (HW stays
    # the minor axis), then zero-pad K up to Kp for a lane-dense MXU operand.
    patches = jnp.transpose(patches, (1, 0, 2)).reshape(K, NHW)
    patches = jnp.pad(patches, ((0, Kp - K), (0, 0))).astype(jnp.bfloat16)

    w1_p = jnp.transpose(w1, (0, 2, 3, 1)).reshape(C_mid, K)     # (kh,kw,c)
    w1_p = jnp.pad(w1_p, ((0, 0), (0, Kp - K))).astype(jnp.bfloat16)
    w2_p = w2.reshape(C_out, C_mid).astype(jnp.bfloat16)

    b1_p = b1.reshape(C_mid, 1).astype(jnp.float32)
    g1_p = g1.reshape(C_mid, 1).astype(jnp.float32)
    be1_p = be1.reshape(C_mid, 1).astype(jnp.float32)
    b2_p = b2.reshape(C_out, 1).astype(jnp.float32)
    g2_p = g2.reshape(C_out, 1).astype(jnp.float32)
    be2_p = be2.reshape(C_out, 1).astype(jnp.float32)

    kernel = functools.partial(_fused_dense_block_kernel,
                               inv_count=1.0 / float(NHW), eps=float(eps))

    out = pl.pallas_call(
        kernel,
        grid=(1,),                            # whole batch = one fused step
        in_specs=[
            pl.BlockSpec((Kp, NHW), lambda i: (0, 0)),
            pl.BlockSpec((C_mid, Kp), lambda i: (0, 0)),
            pl.BlockSpec((C_mid, 1), lambda i: (0, 0)),
            pl.BlockSpec((C_mid, 1), lambda i: (0, 0)),
            pl.BlockSpec((C_mid, 1), lambda i: (0, 0)),
            pl.BlockSpec((C_out, C_mid), lambda i: (0, 0)),
            pl.BlockSpec((C_out, 1), lambda i: (0, 0)),
            pl.BlockSpec((C_out, 1), lambda i: (0, 0)),
            pl.BlockSpec((C_out, 1), lambda i: (0, 0)),
        ],
        out_specs=pl.BlockSpec((C_out, NHW), lambda i: (0, 0)),
        out_shape=jax.ShapeDtypeStruct((C_out, NHW), jnp.float32),
        compiler_params=pltpu.CompilerParams(
            dimension_semantics=("arbitrary",),
            vmem_limit_bytes=32 * 1024 * 1024,   # safe on v5e/v6e/v7x
        ),
    )(patches, w1_p, b1_p, g1_p, be1_p, w2_p, b2_p, g2_p, be2_p)

    # (C_out, N*HW) -> NCHW: leading-axis permutation only (lane axis intact).
    return out.reshape(C_out, N, HW).transpose(1, 0, 2).reshape(N, C_out, H, W)


def _reference(x, w1, b1, g1, be1, w2, b2, g2, be2, eps=1e-5):
    """Pure-JAX f32 reference matching the PyTorch module's forward."""
    def conv_bn_relu(h, w, b, g, be, pad):
        if pad:
            h = jnp.pad(h, ((0, 0), (0, 0), (pad, pad), (pad, pad)),
                        mode="reflect")
        y = lax.conv_general_dilated(
            h, w, window_strides=(1, 1), padding="VALID",
            dimension_numbers=("NCHW", "OIHW", "NCHW"),
            precision=lax.Precision.HIGHEST)
        y = y + b.reshape(1, -1, 1, 1)
        mean = jnp.mean(y, axis=(0, 2, 3), keepdims=True)
        var = jnp.mean(jnp.square(y - mean), axis=(0, 2, 3), keepdims=True)
        y = (y - mean) * lax.rsqrt(var + eps) * g.reshape(1, -1, 1, 1) \
            + be.reshape(1, -1, 1, 1)
        return jnp.maximum(y, 0.0)

    h = conv_bn_relu(x, w1, b1, g1, be1, 1)
    return conv_bn_relu(h, w2, b2, g2, be2, 0)


if __name__ == "__main__":
    # DenseBlock_light(in_channels=4, out_channels=8):
    #   3x3 conv 4 -> 2, then 1x1 conv 2 -> 8.
    N, C_in, H, W = 2, 4, 16, 16
    C_out = 8
    C_mid = C_in // 2

    key = jax.random.PRNGKey(0)
    k = jax.random.split(key, 5)

    x = jax.random.normal(k[0], (N, C_in, H, W), dtype=jnp.float32)
    w1 = jax.random.normal(k[1], (C_mid, C_in, 3, 3), dtype=jnp.float32) * 0.2
    b1 = jax.random.normal(k[2], (C_mid,), dtype=jnp.float32) * 0.1
    w2 = jax.random.normal(k[3], (C_out, C_mid, 1, 1), dtype=jnp.float32) * 0.2
    b2 = jax.random.normal(k[4], (C_out,), dtype=jnp.float32) * 0.1
    # BatchNorm2d default affine init: gamma = 1, beta = 0.
    g1 = jnp.ones((C_mid,), jnp.float32)
    be1 = jnp.zeros((C_mid,), jnp.float32)
    g2 = jnp.ones((C_out,), jnp.float32)
    be2 = jnp.zeros((C_out,), jnp.float32)

    out = dense_block_light(x, w1, b1, g1, be1, w2, b2, g2, be2)
    jax.block_until_ready(out)

    assert out.shape == (N, C_out, H, W)
    assert bool(jnp.all(jnp.isfinite(out)))

    # Correctness vs. f32 reference (bf16 MXU operands => ~1e-2 tolerance).
    ref = _reference(x, w1, b1, g1, be1, w2, b2, g2, be2)
    max_err = float(jnp.max(jnp.abs(out - ref)))
    assert max_err < 0.1, f"max abs error {max_err}"

    print("KERNEL_OK")
</pallas_src>

<mosaic_0001>
module attributes {stable_mosaic.version = 11 : i64} {
  func.func @_fused_dense_block_kernel(%arg0: i32, %arg1: memref<128x512xbf16, #tpu.memory_space<vmem>>, %arg2: memref<2x128xbf16, #tpu.memory_space<vmem>>, %arg3: memref<2x1xf32, #tpu.memory_space<vmem>>, %arg4: memref<2x1xf32, #tpu.memory_space<vmem>>, %arg5: memref<2x1xf32, #tpu.memory_space<vmem>>, %arg6: memref<8x2xbf16, #tpu.memory_space<vmem>>, %arg7: memref<8x1xf32, #tpu.memory_space<vmem>>, %arg8: memref<8x1xf32, #tpu.memory_space<vmem>>, %arg9: memref<8x1xf32, #tpu.memory_space<vmem>>, %arg10: memref<8x512xf32, #tpu.memory_space<vmem>>) attributes {dimension_semantics = [#tpu.dimension_semantics<arbitrary>], iteration_bounds = array<i64: 1>, scalar_prefetch = 0 : i64, scratch_operands = 0 : i64, tpu.core_type = #tpu.core_type<tc>, window_params = [{pipeline_mode = #tpu.pipeline_mode<synchronous>, transform_indices = @transform_0, window_bounds = array<i64: 128, 512>}, {pipeline_mode = #tpu.pipeline_mode<synchronous>, transform_indices = @transform_1, window_bounds = array<i64: 2, 128>}, {pipeline_mode = #tpu.pipeline_mode<synchronous>, transform_indices = @transform_2, window_bounds = array<i64: 2, 1>}, {pipeline_mode = #tpu.pipeline_mode<synchronous>, transform_indices = @transform_3, window_bounds = array<i64: 2, 1>}, {pipeline_mode = #tpu.pipeline_mode<synchronous>, transform_indices = @transform_4, window_bounds = array<i64: 2, 1>}, {pipeline_mode = #tpu.pipeline_mode<synchronous>, transform_indices = @transform_5, window_bounds = array<i64: 8, 2>}, {pipeline_mode = #tpu.pipeline_mode<synchronous>, transform_indices = @transform_6, window_bounds = array<i64: 8, 1>}, {pipeline_mode = #tpu.pipeline_mode<synchronous>, transform_indices = @transform_7, window_bounds = array<i64: 8, 1>}, {pipeline_mode = #tpu.pipeline_mode<synchronous>, transform_indices = @transform_8, window_bounds = array<i64: 8, 1>}, {pipeline_mode = #tpu.pipeline_mode<synchronous>, transform_indices = @transform_9, window_bounds = array<i64: 8, 512>}]} {
    %c0 = arith.constant 0 : index
    %c0_0 = arith.constant 0 : index
    %0 = vector.load %arg2[%c0, %c0_0] : memref<2x128xbf16, #tpu.memory_space<vmem>>, vector<2x128xbf16>
    %c0_1 = arith.constant 0 : index
    %c0_2 = arith.constant 0 : index
    %1 = vector.load %arg1[%c0_1, %c0_2] : memref<128x512xbf16, #tpu.memory_space<vmem>>, vector<128x512xbf16>
    %cst = arith.constant dense<0.000000e+00> : vector<2x512xf32>
    %2 = tpu.matmul %0, %1, %cst {dimension_numbers = #tpu.dot_dimension_numbers<[1], [0], [0], [1], [0, 0, 1, 1], [], []>} : vector<2x128xbf16>, vector<128x512xbf16>, vector<2x512xf32> -> vector<2x512xf32>
    %c0_3 = arith.constant 0 : index
    %c0_4 = arith.constant 0 : index
    %3 = vector.load %arg3[%c0_3, %c0_4] : memref<2x1xf32, #tpu.memory_space<vmem>>, vector<2x1xf32>
    %4 = vector.broadcast %3 : vector<2x1xf32> to vector<2x512xf32>
    %5 = arith.addf %2, %4 : vector<2x512xf32>
    %cst_5 = arith.constant dense<0.000000e+00> : vector<2xf32>
    %6 = vector.multi_reduction <add>, %5, %cst_5 [1] : vector<2x512xf32> to vector<2xf32>
    %7 = vector.shape_cast %6 : vector<2xf32> to vector<2x1xf32>
    %cst_6 = arith.constant 0.001953125 : f32
    %8 = vector.broadcast %cst_6 : f32 to vector<2x1xf32>
    %9 = arith.mulf %7, %8 : vector<2x1xf32>
    %10 = vector.broadcast %9 : vector<2x1xf32> to vector<2x512xf32>
    %11 = arith.subf %5, %10 : vector<2x512xf32>
    %12 = arith.mulf %11, %11 : vector<2x512xf32>
    %cst_7 = arith.constant dense<0.000000e+00> : vector<2xf32>
    %13 = vector.multi_reduction <add>, %12, %cst_7 [1] : vector<2x512xf32> to vector<2xf32>
    %14 = vector.shape_cast %13 : vector<2xf32> to vector<2x1xf32>
    %cst_8 = arith.constant 0.001953125 : f32
    %15 = vector.broadcast %cst_8 : f32 to vector<2x1xf32>
    %16 = arith.mulf %14, %15 : vector<2x1xf32>
    %c0_9 = arith.constant 0 : index
    %c0_10 = arith.constant 0 : index
    %17 = vector.load %arg4[%c0_9, %c0_10] : memref<2x1xf32, #tpu.memory_space<vmem>>, vector<2x1xf32>
    %cst_11 = arith.constant 9.99999974E-6 : f32
    %18 = vector.broadcast %cst_11 : f32 to vector<2x1xf32>
    %19 = arith.addf %16, %18 : vector<2x1xf32>
    %20 = math.rsqrt %19 : vector<2x1xf32>
    %21 = arith.mulf %17, %20 : vector<2x1xf32>
    %22 = vector.broadcast %21 : vector<2x1xf32> to vector<2x512xf32>
    %23 = arith.mulf %11, %22 : vector<2x512xf32>
    %c0_12 = arith.constant 0 : index
    %c0_13 = arith.constant 0 : index
    %24 = vector.load %arg5[%c0_12, %c0_13] : memref<2x1xf32, #tpu.memory_space<vmem>>, vector<2x1xf32>
    %25 = vector.broadcast %24 : vector<2x1xf32> to vector<2x512xf32>
    %26 = arith.addf %23, %25 : vector<2x512xf32>
    %cst_14 = arith.constant 0.000000e+00 : f32
    %27 = vector.broadcast %cst_14 : f32 to vector<2x512xf32>
    %28 = arith.maximumf %26, %27 : vector<2x512xf32>
    %c0_15 = arith.constant 0 : index
    %c0_16 = arith.constant 0 : index
    %29 = vector.load %arg6[%c0_15, %c0_16] : memref<8x2xbf16, #tpu.memory_space<vmem>>, vector<8x2xbf16>
    %30 = arith.truncf %28 : vector<2x512xf32> to vector<2x512xbf16>
    %cst_17 = arith.constant dense<0.000000e+00> : vector<8x512xf32>
    %31 = tpu.matmul %29, %30, %cst_17 {dimension_numbers = #tpu.dot_dimension_numbers<[1], [0], [0], [1], [0, 0, 1, 1], [], []>} : vector<8x2xbf16>, vector<2x512xbf16>, vector<8x512xf32> -> vector<8x512xf32>
    %c0_18 = arith.constant 0 : index
    %c0_19 = arith.constant 0 : index
    %32 = vector.load %arg7[%c0_18, %c0_19] : memref<8x1xf32, #tpu.memory_space<vmem>>, vector<8x1xf32>
    %33 = vector.broadcast %32 : vector<8x1xf32> to vector<8x512xf32>
    %34 = arith.addf %31, %33 : vector<8x512xf32>
    %cst_20 = arith.constant dense<0.000000e+00> : vector<8xf32>
    %35 = vector.multi_reduction <add>, %34, %cst_20 [1] : vector<8x512xf32> to vector<8xf32>
    %36 = vector.shape_cast %35 : vector<8xf32> to vector<8x1xf32>
    %cst_21 = arith.constant 0.001953125 : f32
    %37 = vector.broadcast %cst_21 : f32 to vector<8x1xf32>
    %38 = arith.mulf %36, %37 : vector<8x1xf32>
    %39 = vector.broadcast %38 : vector<8x1xf32> to vector<8x512xf32>
    %40 = arith.subf %34, %39 : vector<8x512xf32>
    %41 = arith.mulf %40, %40 : vector<8x512xf32>
    %cst_22 = arith.constant dense<0.000000e+00> : vector<8xf32>
    %42 = vector.multi_reduction <add>, %41, %cst_22 [1] : vector<8x512xf32> to vector<8xf32>
    %43 = vector.shape_cast %42 : vector<8xf32> to vector<8x1xf32>
    %cst_23 = arith.constant 0.001953125 : f32
    %44 = vector.broadcast %cst_23 : f32 to vector<8x1xf32>
    %45 = arith.mulf %43, %44 : vector<8x1xf32>
    %c0_24 = arith.constant 0 : index
    %c0_25 = arith.constant 0 : index
    %46 = vector.load %arg8[%c0_24, %c0_25] : memref<8x1xf32, #tpu.memory_space<vmem>>, vector<8x1xf32>
    %cst_26 = arith.constant 9.99999974E-6 : f32
    %47 = vector.broadcast %cst_26 : f32 to vector<8x1xf32>
    %48 = arith.addf %45, %47 : vector<8x1xf32>
    %49 = math.rsqrt %48 : vector<8x1xf32>
    %50 = arith.mulf %46, %49 : vector<8x1xf32>
    %51 = vector.broadcast %50 : vector<8x1xf32> to vector<8x512xf32>
    %52 = arith.mulf %40, %51 : vector<8x512xf32>
    %c0_27 = arith.constant 0 : index
    %c0_28 = arith.constant 0 : index
    %53 = vector.load %arg9[%c0_27, %c0_28] : memref<8x1xf32, #tpu.memory_space<vmem>>, vector<8x1xf32>
    %54 = vector.broadcast %53 : vector<8x1xf32> to vector<8x512xf32>
    %55 = arith.addf %52, %54 : vector<8x512xf32>
    %cst_29 = arith.constant 0.000000e+00 : f32
    %56 = vector.broadcast %cst_29 : f32 to vector<8x512xf32>
    %57 = arith.maximumf %55, %56 : vector<8x512xf32>
    %c0_30 = arith.constant 0 : index
    %c0_31 = arith.constant 0 : index
    %58 = vector.load %arg10[%c0_30, %c0_31] : memref<8x512xf32, #tpu.memory_space<vmem>>, vector<8x512xf32>
    tpu.vector_store %arg10[%c0_30, %c0_31], %57 {strides = array<i32>} : memref<8x512xf32, #tpu.memory_space<vmem>>, vector<8x512xf32>,
    return
  }
  func.func @transform_0(%arg0: i32) -> (i32, i32) {
    %c0_i32 = arith.constant 0 : i32
    %c0_i32_0 = arith.constant 0 : i32
    %c0_i32_1 = arith.constant 0 : i32
    return %c0_i32, %c0_i32_0 : i32, i32
  }
  func.func @transform_1(%arg0: i32) -> (i32, i32) {
    %c0_i32 = arith.constant 0 : i32
    %c0_i32_0 = arith.constant 0 : i32
    %c0_i32_1 = arith.constant 0 : i32
    return %c0_i32, %c0_i32_0 : i32, i32
  }
  func.func @transform_2(%arg0: i32) -> (i32, i32) {
    %c0_i32 = arith.constant 0 : i32
    %c0_i32_0 = arith.constant 0 : i32
    %c0_i32_1 = arith.constant 0 : i32
    return %c0_i32, %c0_i32_0 : i32, i32
  }
  func.func @transform_3(%arg0: i32) -> (i32, i32) {
    %c0_i32 = arith.constant 0 : i32
    %c0_i32_0 = arith.constant 0 : i32
    %c0_i32_1 = arith.constant 0 : i32
    return %c0_i32, %c0_i32_0 : i32, i32
  }
  func.func @transform_4(%arg0: i32) -> (i32, i32) {
    %c0_i32 = arith.constant 0 : i32
    %c0_i32_0 = arith.constant 0 : i32
    %c0_i32_1 = arith.constant 0 : i32
    return %c0_i32, %c0_i32_0 : i32, i32
  }
  func.func @transform_5(%arg0: i32) -> (i32, i32) {
    %c0_i32 = arith.constant 0 : i32
    %c0_i32_0 = arith.constant 0 : i32
    %c0_i32_1 = arith.constant 0 : i32
    return %c0_i32, %c0_i32_0 : i32, i32
  }
  func.func @transform_6(%arg0: i32) -> (i32, i32) {
    %c0_i32 = arith.constant 0 : i32
    %c0_i32_0 = arith.constant 0 : i32
    %c0_i32_1 = arith.constant 0 : i32
    return %c0_i32, %c0_i32_0 : i32, i32
  }
  func.func @transform_7(%arg0: i32) -> (i32, i32) {
    %c0_i32 = arith.constant 0 : i32
    %c0_i32_0 = arith.constant 0 : i32
    %c0_i32_1 = arith.constant 0 : i32
    return %c0_i32, %c0_i32_0 : i32, i32
  }
  func.func @transform_8(%arg0: i32) -> (i32, i32) {
    %c0_i32 = arith.constant 0 : i32
    %c0_i32_0 = arith.constant 0 : i32
    %c0_i32_1 = arith.constant 0 : i32
    return %c0_i32, %c0_i32_0 : i32, i32
  }
  func.func @transform_9(%arg0: i32) -> (i32, i32) {
    %c0_i32 = arith.constant 0 : i32
    %c0_i32_0 = arith.constant 0 : i32
    %c0_i32_1 = arith.constant 0 : i32
    return %c0_i32, %c0_i32_0 : i32, i32
  }
}

</mosaic_0001>

<bundles_post_ra>
// kernel: dense_block_light.1
= control target key start
LH: loop header
LB: loop body
LE: loop exit
PB: predicated region body
PF: predicated region fallthrough
CT: control target
= control target key end

     0   :  { %vm284_vm0 = vcmask 1041408   ;;  %vm364_vm4 = vcmask 1040384   ;;  %vm360_vm5 = vcmask 15360   ;;  %s952_s0 = inlined_call_operand.vmem [shape: bf16[128,512], index: 0, kind: input, shape index: {}]   ;;  %s953_s2 = inlined_call_operand.vmem [shape: f32[2,1], index: 2, kind: input, shape index: {}]   ;;  %s954_s1 = inlined_call_operand.vmem [shape: bf16[2,128], index: 1, kind: input, shape index: {}]   ;;  %s955_s4 = inlined_call_operand.vmem [shape: f32[2,1], index: 4, kind: input, shape index: {}]   ;;  %s956_s6 = inlined_call_operand.vmem [shape: f32[8,1], index: 6, kind: input, shape index: {}]   ;;  %s957_s3 = inlined_call_operand.vmem [shape: f32[2,1], index: 3, kind: input, shape index: {}]   ;;  %s958_s5 = inlined_call_operand.vmem [shape: bf16[8,2], index: 5, kind: input, shape index: {}]   ;;  %s959_s8 = inlined_call_operand.vmem [shape: f32[8,1], index: 8, kind: input, shape index: {}]   ;;  %s960_s7 = inlined_call_operand.vmem [shape: f32[8,1], index: 7, kind: input, shape index: {}]   ;;  %s961_s9 = inlined_call_operand.vmem [shape: f32[8,512], index: 9, kind: output, shape index: {}]  }
   0x1   :  { %v607_v0 = vld [vmem:[%s952_s0 + $0xe0] sm:$0xf]  ;;  %v655_v1 = vld [vmem:[%s952_s0 + $0xec] sm:$0xf0]  ;;  %v653_v2 = vld [vmem:[%s952_s0 + $0xe4] sm:$0xf] }
   0x2   :  { %v608_v3 = vor.u32 %v655_v1, %v607_v0  ;;  %v609_v4 = vld [vmem:[%s952_s0 + $0xf0] sm:$0xf0]  ;;  %v615_v5 = vld [vmem:[%s952_s0 + $0xe8] sm:$0xf]  ;;  %v656_v6 = vld [vmem:[%s952_s0 + $0xf4] sm:$0xf0] }
   0x3   :  { %v612_v7 = vor.u32 %v653_v2, %v609_v4  ;;  %v616_v8 = vor.u32 %v656_v6, %v615_v5  ;;  %v654_v9 = vld [vmem:[%s952_s0 + $0xec] sm:$0xf]  ;;  %v617_v10 = vld [vmem:[%s952_s0 + $0xf8] sm:$0xf0]  ;;  %v591_v11 = vld [vmem:[%s952_s0 + $0xc0] sm:$0xf] }
   0x4   :  { %232 = vmatpush.bf16.msra.mxu0 %v608_v3  ;;  %v620_v12 = vor.u32 %v654_v9, %v617_v10  ;;  %v651_v13 = vld [vmem:[%s952_s0 + $0xcc] sm:$0xf0]  ;;  %v649_v14 = vld [vmem:[%s952_s0 + $0xc4] sm:$0xf]  ;;  %v593_v15 = vld [vmem:[%s952_s0 + $0xd0] sm:$0xf0] }
   0x5   :  { %245 = vmatpush.bf16.msra.mxu1 %v612_v7  ;;  %258 = vmatpush.bf16.msra.mxu2 %v616_v8  ;;  %v592_v16 = vor.u32 %v651_v13, %v591_v11  ;;  %v596_v17 = vor.u32 %v649_v14, %v593_v15  ;;  %v599_v18 = vld [vmem:[%s952_s0 + $0xc8] sm:$0xf]  ;;  %v652_v19 = vld [vmem:[%s952_s0 + $0xd4] sm:$0xf0]  ;;  %v650_v20 = vld [vmem:[%s952_s0 + $0xcc] sm:$0xf] }
   0x6   :  { %271 = vmatpush.bf16.msra.mxu3 %v620_v12  ;;  %v600_v21 = vor.u32 %v652_v19, %v599_v18  ;;  %v601_v22 = vld [vmem:[%s952_s0 + $0xd8] sm:$0xf0]  ;;  %v575_v23 = vld [vmem:[%s952_s0 + $0xa0] sm:$0xf]  ;;  %v647_v24 = vld [vmem:[%s952_s0 + $0xac] sm:$0xf0] }
   0x7   :  { %v604_v25 = vor.u32 %v650_v20, %v601_v22  ;;  %v645_v26 = vld [vmem:[%s952_s0 + $0xa4] sm:$0xf]  ;;  %v577_v27 = vld [vmem:[%s952_s0 + $0xb0] sm:$0xf0]  ;;  %v583_v28 = vld [vmem:[%s952_s0 + $0xa8] sm:$0xf]  ;;  %v576_v29 = vor.u32 %v647_v24, %v575_v23 }
   0x8   :  { %233 = vmatpush.bf16.msra.mxu0 %v592_v16  ;;  %v648_v30 = vld [vmem:[%s952_s0 + $0xb4] sm:$0xf0]  ;;  %v646_v31 = vld [vmem:[%s952_s0 + $0xac] sm:$0xf]  ;;  %v585_v32 = vld [vmem:[%s952_s0 + $0xb8] sm:$0xf0]  ;;  %v580_v33 = vor.u32 %v645_v26, %v577_v27 }
   0x9   :  { %246 = vmatpush.bf16.msra.mxu1 %v596_v17  ;;  %259 = vmatpush.bf16.msra.mxu2 %v600_v21  ;;  %v584_v34 = vor.u32 %v648_v30, %v583_v28  ;;  %v559_v35 = vld [vmem:[%s952_s0 + $0x80] sm:$0xf]  ;;  %v643_v36 = vld [vmem:[%s952_s0 + $0x8c] sm:$0xf0]  ;;  %v641_v37 = vld [vmem:[%s952_s0 + $0x84] sm:$0xf]  ;;  %v588_v38 = vor.u32 %v646_v31, %v585_v32 }
   0xa   :  { %272 = vmatpush.bf16.msra.mxu3 %v604_v25  ;;  %v561_v39 = vld [vmem:[%s952_s0 + $0x90] sm:$0xf0]  ;;  %v567_v40 = vld [vmem:[%s952_s0 + $0x88] sm:$0xf]  ;;  %v644_v41 = vld [vmem:[%s952_s0 + $0x94] sm:$0xf0]  ;;  %v560_v44 = vor.u32 %v643_v36, %v559_v35 }
   0xb   :  { %v642_v42 = vld [vmem:[%s952_s0 + $0x8c] sm:$0xf]  ;;  %v569_v43 = vld [vmem:[%s952_s0 + $0x98] sm:$0xf0]  ;;  %v564_v45 = vor.u32 %v641_v37, %v561_v39  ;;  %v568_v46 = vor.u32 %v644_v41, %v567_v40  ;;  %v543_v47 = vld [vmem:[%s952_s0 + $0x60] sm:$0xf] }
   0xc   :  { %234 = vmatpush.bf16.msra.mxu0 %v576_v29  ;;  %v639_v48 = vld [vmem:[%s952_s0 + $0x6c] sm:$0xf0]  ;;  %v637_v49 = vld [vmem:[%s952_s0 + $0x64] sm:$0xf]  ;;  %v572_v50 = vor.u32 %v642_v42, %v569_v43  ;;  %v545_v51 = vld [vmem:[%s952_s0 + $0x70] sm:$0xf0] }
   0xd   :  { %247 = vmatpush.bf16.msra.mxu1 %v580_v33  ;;  %260 = vmatpush.bf16.msra.mxu2 %v584_v34  ;;  %v551_v52 = vld [vmem:[%s952_s0 + $0x68] sm:$0xf]  ;;  %v640_v53 = vld [vmem:[%s952_s0 + $0x74] sm:$0xf0]  ;;  %v638_v54 = vld [vmem:[%s952_s0 + $0x6c] sm:$0xf]  ;;  %v544_v56 = vor.u32 %v639_v48, %v543_v47  ;;  %v548_v57 = vor.u32 %v637_v49, %v545_v51 }
   0xe   :  { %273 = vmatpush.bf16.msra.mxu3 %v588_v38  ;;  %v553_v55 = vld [vmem:[%s952_s0 + $0x78] sm:$0xf0]  ;;  %v552_v58 = vor.u32 %v640_v53, %v551_v52  ;;  %v527_v59 = vld [vmem:[%s952_s0 + $0x40] sm:$0xf]  ;;  %v635_v60 = vld [vmem:[%s952_s0 + $0x4c] sm:$0xf0] }
   0xf   :  { %v633_v61 = vld [vmem:[%s952_s0 + $0x44] sm:$0xf]  ;;  %v556_v62 = vor.u32 %v638_v54, %v553_v55  ;;  %v529_v63 = vld [vmem:[%s952_s0 + $0x50] sm:$0xf0]  ;;  %v535_v0 = vld [vmem:[%s952_s0 + $0x48] sm:$0xf]  ;;  %v528_v4 = vor.u32 %v635_v60, %v527_v59 }
  0x10   :  { %235 = vmatpush.bf16.msra.mxu0 %v560_v44  ;;  %v636_v1 = vld [vmem:[%s952_s0 + $0x54] sm:$0xf0]  ;;  %v634_v2 = vld [vmem:[%s952_s0 + $0x4c] sm:$0xf]  ;;  %v537_v3 = vld [vmem:[%s952_s0 + $0x58] sm:$0xf0]  ;;  %v532_v6 = vor.u32 %v633_v61, %v529_v63 }
  0x11   :  { %248 = vmatpush.bf16.msra.mxu1 %v564_v45  ;;  %261 = vmatpush.bf16.msra.mxu2 %v568_v46  ;;  %v511_v5 = vld [vmem:[%s952_s0 + $0x20] sm:$0xf]  ;;  %v536_v7 = vor.u32 %v636_v1, %v535_v0  ;;  %v631_v8 = vld [vmem:[%s952_s0 + $0x2c] sm:$0xf0]  ;;  %v629_v9 = vld [vmem:[%s952_s0 + $0x24] sm:$0xf]  ;;  %v540_v11 = vor.u32 %v634_v2, %v537_v3 }
  0x12   :  { %274 = vmatpush.bf16.msra.mxu3 %v572_v50  ;;  %v513_v10 = vld [vmem:[%s952_s0 + $0x30] sm:$0xf0]  ;;  %v519_v12 = vld [vmem:[%s952_s0 + $0x28] sm:$0xf]  ;;  %v632_v13 = vld [vmem:[%s952_s0 + $0x34] sm:$0xf0]  ;;  %v512_v18 = vor.u32 %v631_v8, %v511_v5 }
  0x13   :  { %v630_v14 = vld [vmem:[%s952_s0 + $0x2c] sm:$0xf]  ;;  %v521_v15 = vld [vmem:[%s952_s0 + $0x38] sm:$0xf0]  ;;  %v665_v16 = vmov 0   ;;  %v516_v19 = vor.u32 %v629_v9, %v513_v10  ;;  %v520_v20 = vor.u32 %v632_v13, %v519_v12  ;;  %v354_v9 = vld [vmem:[%s956_s6] sm:$0xff] }
  0x14   :  { %236 = vmatpush.bf16.msra.mxu0 %v544_v56  ;;  %658 = vset.pattern.permute.xlu0 %v665_v16  ;;  %v66_v17 = vld [vmem:[%s953_s2] sm:$0x3]  ;;  %v627_v22 = vld [vmem:[%s952_s0 + $0xc] sm:$0xf0]  ;;  %v625_v23 = vld [vmem:[%s952_s0 + $0x4] sm:$0xf]  ;;  %v524_v24 = vor.u32 %v630_v14, %v521_v15 }
  0x15   :  { %249 = vmatpush.bf16.msra.mxu1 %v548_v57  ;;  %262 = vmatpush.bf16.msra.mxu2 %v552_v58  ;;  %v495_v21 = vld [vmem:[%s952_s0] sm:$0xf]  ;;  %v497_v25 = vld [vmem:[%s952_s0 + $0x10] sm:$0xf0]  ;;  %v503_v26 = vld [vmem:[%s952_s0 + $0x8] sm:$0xf] }
  0x16   :  { %275 = vmatpush.bf16.msra.mxu3 %v556_v62  ;;  %659 = vset.pattern.permute.xlu1 %v665_v16  ;;  %v628_v27 = vld [vmem:[%s952_s0 + $0x14] sm:$0xf0]  ;;  %v626_v28 = vld [vmem:[%s952_s0 + $0xc] sm:$0xf]  ;;  %v505_v29 = vld [vmem:[%s952_s0 + $0x18] sm:$0xf0]  ;;  %v496_v30 = vor.u32 %v627_v22, %v495_v21  ;;  %v500_v31 = vor.u32 %v625_v23, %v497_v25 }
  0x17   :  { %69 = vperm.xlu0 %658, %v66_v17   ;;  %660 = vset.pattern.permute.xlu2 %v665_v16  ;;  %v504_v32 = vor.u32 %v628_v27, %v503_v26  ;;  %v508_v33 = vor.u32 %v626_v28, %v505_v29  ;;  %v33_v34 = vld [vmem:[%s954_s1] sm:$0x1] }
  0x18   :  { %237 = vmatpush.bf16.msra.mxu0 %v528_v4  ;;  %v335_v8 = vld [vmem:[%s955_s4] sm:$0x3] }
  0x19   :  { %250 = vmatpush.bf16.msra.mxu1 %v532_v6  ;;  %263 = vmatpush.bf16.msra.mxu2 %v536_v7 }
  0x1a   :  { %276 = vmatpush.bf16.msra.mxu3 %v540_v11  ;;  %338 = vperm.xlu2 %660, %v335_v8  }
  0x1c   :  { %238 = vmatpush.bf16.msra.mxu0 %v512_v18  ;;  %v313_v18 = vld [vmem:[%s957_s3] sm:$0x3] }
  0x1d   :  { %251 = vmatpush.bf16.msra.mxu1 %v516_v19  ;;  %264 = vmatpush.bf16.msra.mxu2 %v520_v20 }
  0x1e   :  { %277 = vmatpush.bf16.msra.mxu3 %v524_v24 }
  0x20   :  { %239 = vmatpush.bf16.msra.mxu0 %v496_v30 }
  0x21   :  { %252 = vmatpush.bf16.msra.mxu1 %v500_v31  ;;  %265 = vmatpush.bf16.msra.mxu2 %v504_v32 }
  0x22   :  { %278 = vmatpush.bf16.msra.mxu3 %v508_v33  ;;  %357 = vperm.xlu2 %660, %v354_v9  }
  0x23   :  { %240 = vmatmul.bf16.vlgmr.msra.gmra.mxu0 %v33_v34 }
  0x24   :  { %253 = vmatmul.bf16.vlgmr.msra.gmra.mxu1 %v33_v34  ;;  %266 = vmatmul.bf16.vlgmr.msra.gmra.mxu2 %v33_v34 }
  0x25   :  { %279 = vmatmul.bf16.vlgmr.msra.gmra.mxu3 %v33_v34 }
  0x74   :  { %v339_v27 = vpop.permute.xlu2 %338 }
  0x89   :  { %v70_v35 = vpop.permute.xlu0 %69 }
  0xa0   :  { %v241_v36 = vpop.f32.mrf.mxu0 }
  0xa1   :  { %v254_v37 = vpop.f32.mrf.mxu1  ;;  %v242_v38 = vadd.f32 %v241_v36, %v70_v35 }
  0xa2   :  { %v255_v39 = vadd.f32 %v254_v37, %v70_v35 }
  0xa3   :  { %v285_v40 = vsel %vm284_vm0, %v242_v38, 0.0 }
  0xa4   :  { %v286_v41 = vsel %vm284_vm0, %v255_v39, 0.0 }
  0xa5   :  { %v287_v43 = vadd.f32 %v286_v41, %v285_v40 }
  0xa7   :  { %v267_v42 = vpop.f32.mrf.mxu2 }
  0xa8   :  { %v268_v44 = vadd.f32 %v267_v42, %v70_v35  ;;  %v280_v45 = vpop.f32.mrf.mxu3  ;;  %v243_v46 = vpop.f32.mrf.mxu0 }
  0xa9   :  { %v281_v47 = vadd.f32 %v280_v45, %v70_v35  ;;  %v256_v48 = vpop.f32.mrf.mxu1 }
  0xaa   :  { %v288_v49 = vsel %vm284_vm0, %v268_v44, 0.0 }
  0xab   :  { %v289_v50 = vadd.f32 %v288_v49, %v287_v43  ;;  %v290_v51 = vsel %vm284_vm0, %v281_v47, 0.0 }
  0xad   :  { %v291_v52 = vadd.f32 %v290_v51, %v289_v50 }
  0xaf   :  { %v269_v53 = vpop.f32.mrf.mxu2  ;;  %292 = vadd.xlane.f32.xlu0 %v291_v52 }
  0xb0   :  { %v282_v54 = vpop.f32.mrf.mxu3 }
 0x122   :  { %v293_v55 = vpop.xlane.xlu0 %292 }
 0x123   :  { %v294_v56 = vmul.f32 0.001953125, %v293_v55 }
 0x125   :  { %v295_v57 = vsub.f32 %v242_v38, %v294_v56  ;;  %v296_v58 = vsub.f32 %v255_v39, %v294_v56  ;;  %v297_v59 = vsub.f32 %v268_v44, %v294_v56  ;;  %v298_v60 = vsub.f32 %v281_v47, %v294_v56  ;;  %v349_v44 = vld [vmem:[%s958_s5] sm:$0xf]  ;;  %v358_v47 = vpop.permute.xlu2 %357 }
 0x127   :  { %v299_v61 = vmul.f32 %v295_v57, %v295_v57  ;;  %v300_v62 = vmul.f32 %v296_v58, %v296_v58  ;;  %v301_v63 = vmul.f32 %v297_v59, %v297_v59  ;;  %v302_v0 = vmul.f32 %v298_v60, %v298_v60 }
 0x129   :  { %v303_v1 = vsel %vm284_vm0, %v299_v61, 0.0  ;;  %v304_v2 = vsel %vm284_vm0, %v300_v62, 0.0  ;;  %v306_v4 = vsel %vm284_vm0, %v301_v63, 0.0  ;;  %v308_v6 = vsel %vm284_vm0, %v302_v0, 0.0  ;;  %v471_v61 = vld [vmem:[%s959_s8] sm:$0xff] }
 0x12a   :  { %v305_v3 = vadd.f32 %v304_v2, %v303_v1 }
 0x12c   :  { %v307_v5 = vadd.f32 %v306_v4, %v305_v3 }
 0x12e   :  { %v309_v7 = vadd.f32 %v308_v6, %v307_v5 }
 0x130   :  { %310 = vadd.xlane.f32.xlu1 %v309_v7 }
 0x1a3   :  { %v311_v10 = vpop.xlane.xlu1 %310 }
 0x1a4   :  { %v312_v11 = vmul.f32 0.001953125, %v311_v10 }
 0x1a6   :  { %v314_v12 = vadd.f32 1e-05, %v312_v11 }
 0x1a8   :  { %661 = vrsqrt.f32 %v314_v12  ;;  %vm321_vm2 = vweird.f32 %v314_v12 }
 0x1ae   :  { %v662_v13 = vpop.eup %661 }
 0x1af   :  { %v316_v14 = vmul.f32 %v662_v13, %v314_v12  ;;  %vm322_vm1 = vweird.f32 %v662_v13 }
 0x1b0   :  { %vm323_vm3 = vmor %vm321_vm2, %vm322_vm1 }
 0x1b1   :  { %v317_v15 = vmul.f32 %v662_v13, %v316_v14 }
 0x1b3   :  { %v318_v16 = vmul.f32 0.5, %v317_v15 }
 0x1b5   :  { %v319_v17 = vsub.f32 1.5, %v318_v16 }
 0x1b7   :  { %v320_v19 = vmul.f32 %v662_v13, %v319_v17 }
 0x1b9   :  { %v324_v20 = vsel %vm323_vm3, %v662_v13, %v320_v19  ;;  %v449_v19 = vld [vmem:[%s960_s7] sm:$0xff] }
 0x1ba   :  { %v325_v21 = vmul.f32 %v324_v20, %v313_v18 }
 0x1bc   :  { %328 = vperm.xlu1 %659, %v325_v21  }
 0x22e   :  { %v329_v22 = vpop.permute.xlu1 %328 }
 0x22f   :  { %v331_v23 = vmul.f32 %v329_v22, %v295_v57  ;;  %v332_v24 = vmul.f32 %v329_v22, %v296_v58  ;;  %v333_v25 = vmul.f32 %v329_v22, %v297_v59  ;;  %v334_v26 = vmul.f32 %v329_v22, %v298_v60 }
 0x231   :  { %v341_v28 = vadd.f32 %v339_v27, %v331_v23  ;;  %v342_v29 = vadd.f32 %v339_v27, %v332_v24  ;;  %v343_v30 = vadd.f32 %v339_v27, %v333_v25  ;;  %v344_v31 = vadd.f32 %v339_v27, %v334_v26 }
 0x233   :  { %v345_v32 = vmax.f32 %v341_v28, 0.0  ;;  %v346_v33 = vmax.f32 %v342_v29, 0.0  ;;  %v347_v34 = vmax.f32 %v343_v30, 0.0  ;;  %v348_v35 = vmax.f32 %v344_v31, 0.0 }
 0x235   :  { %v350_v36 = vpack.c.bf16 %v345_v32, %v345_v32  ;;  %v351_v37 = vpack.c.bf16 %v346_v33, %v346_v33  ;;  %v352_v38 = vpack.c.bf16 %v347_v34, %v347_v34  ;;  %v353_v39 = vpack.c.bf16 %v348_v35, %v348_v35 }
 0x237   :  { %v366_v40 = vsel %vm364_vm4, %v350_v36, 0  ;;  %v369_v41 = vsel %vm364_vm4, %v351_v37, 0  ;;  %v372_v42 = vsel %vm364_vm4, %v352_v38, 0  ;;  %v375_v43 = vsel %vm364_vm4, %v353_v39, 0 }
 0x238   :  { %384 = vmatpush.bf16.msrb.mxu0 %v366_v40  ;;  %397 = vmatpush.bf16.msrb.mxu1 %v369_v41 }
 0x239   :  { %410 = vmatpush.bf16.msrb.mxu2 %v372_v42  ;;  %423 = vmatpush.bf16.msrb.mxu3 %v375_v43 }
 0x23b   :  { %621 = vmatmul.msk.bf16.vlgmr.msrb.gmra.mxu0 %vm360_vm5, %v349_v44  ;;  %622 = vmatmul.msk.bf16.vlgmr.msrb.gmra.mxu1 %vm360_vm5, %v349_v44 }
 0x23c   :  { %623 = vmatmul.msk.bf16.vlgmr.msrb.gmra.mxu2 %vm360_vm5, %v349_v44  ;;  %624 = vmatmul.msk.bf16.vlgmr.msrb.gmra.mxu3 %vm360_vm5, %v349_v44 }
 0x2b8   :  { %v386_v45 = vpop.f32.mrf.mxu0  ;;  %v399_v46 = vpop.f32.mrf.mxu1 }
 0x2b9   :  { %v387_v48 = vadd.f32 %v386_v45, %v358_v47  ;;  %v400_v49 = vadd.f32 %v399_v46, %v358_v47 }
 0x2bb   :  { %v429_v52 = vadd.f32 %v400_v49, %v387_v48 }
 0x2bf   :  { %v412_v50 = vpop.f32.mrf.mxu2  ;;  %v425_v51 = vpop.f32.mrf.mxu3 }
 0x2c0   :  { %v413_v53 = vadd.f32 %v412_v50, %v358_v47  ;;  %v388_v54 = vpop.f32.mrf.mxu0  ;;  %v401_v55 = vpop.f32.mrf.mxu1  ;;  %v426_v57 = vadd.f32 %v425_v51, %v358_v47 }
 0x2c2   :  { %v430_v56 = vadd.f32 %v429_v52, %v413_v53 }
 0x2c4   :  { %v431_v58 = vadd.f32 %v430_v56, %v426_v57 }
 0x2c6   :  { %432 = vadd.xlane.f32.xlu2 %v431_v58 }
 0x2c7   :  { %v414_v59 = vpop.f32.mrf.mxu2  ;;  %v427_v60 = vpop.f32.mrf.mxu3 }
 0x2de   :  { %474 = vperm.xlu2 %660, %v471_v61  }
 0x339   :  { %v433_v62 = vpop.xlane.xlu2 %432 }
 0x33a   :  { %v434_v63 = vmul.f32 0.001953125, %v433_v62 }
 0x33c   :  { %v435_v0 = vsub.f32 %v387_v48, %v434_v63  ;;  %v436_v1 = vsub.f32 %v400_v49, %v434_v63  ;;  %v437_v2 = vsub.f32 %v413_v53, %v434_v63  ;;  %v438_v3 = vsub.f32 %v426_v57, %v434_v63 }
 0x33e   :  { %v439_v4 = vmul.f32 %v435_v0, %v435_v0  ;;  %v440_v5 = vmul.f32 %v436_v1, %v436_v1  ;;  %v441_v6 = vmul.f32 %v437_v2, %v437_v2  ;;  %v442_v8 = vmul.f32 %v438_v3, %v438_v3 }
 0x340   :  { %v443_v7 = vadd.f32 %v440_v5, %v439_v4 }
 0x341   :  { %v475_v28 = vpop.permute.xlu2 %474 }
 0x342   :  { %v444_v9 = vadd.f32 %v443_v7, %v441_v6 }
 0x344   :  { %v445_v10 = vadd.f32 %v444_v9, %v442_v8 }
 0x346   :  { %446 = vadd.xlane.f32.xlu1 %v445_v10 }
 0x3b9   :  { %v447_v11 = vpop.xlane.xlu1 %446 }
 0x3ba   :  { %v448_v12 = vmul.f32 0.001953125, %v447_v11 }
 0x3bc   :  { %v450_v13 = vadd.f32 1e-05, %v448_v12 }
 0x3be   :  { %663 = vrsqrt.f32 %v450_v13  ;;  %vm457_vm7 = vweird.f32 %v450_v13 }
 0x3c4   :  { %v664_v14 = vpop.eup %663 }
 0x3c5   :  { %v452_v15 = vmul.f32 %v664_v14, %v450_v13  ;;  %vm458_vm6 = vweird.f32 %v664_v14 }
 0x3c6   :  { %vm459_vm8 = vmor %vm457_vm7, %vm458_vm6 }
 0x3c7   :  { %v453_v16 = vmul.f32 %v664_v14, %v452_v15 }
 0x3c9   :  { %v454_v17 = vmul.f32 0.5, %v453_v16 }
 0x3cb   :  { %v455_v18 = vsub.f32 1.5, %v454_v17 }
 0x3cd   :  { %v456_v20 = vmul.f32 %v664_v14, %v455_v18 }
 0x3cf   :  { %v460_v21 = vsel %vm459_vm8, %v664_v14, %v456_v20 }
 0x3d0   :  { %v461_v22 = vmul.f32 %v460_v21, %v449_v19 }
 0x3d2   :  { %464 = vperm.xlu0 %658, %v461_v22  }
 0x444   :  { %v465_v23 = vpop.permute.xlu0 %464 }
 0x445   :  { %v467_v24 = vmul.f32 %v465_v23, %v435_v0  ;;  %v468_v25 = vmul.f32 %v465_v23, %v436_v1  ;;  %v469_v26 = vmul.f32 %v465_v23, %v437_v2  ;;  %v470_v27 = vmul.f32 %v465_v23, %v438_v3 }
 0x447   :  { %v477_v29 = vadd.f32 %v475_v28, %v467_v24  ;;  %v478_v30 = vadd.f32 %v475_v28, %v468_v25  ;;  %v479_v31 = vadd.f32 %v475_v28, %v469_v26  ;;  %v480_v32 = vadd.f32 %v475_v28, %v470_v27 }
 0x449   :  { %v481_v33 = vmax.f32 %v477_v29, 0.0  ;;  %v482_v34 = vmax.f32 %v478_v30, 0.0  ;;  %v483_v35 = vmax.f32 %v479_v31, 0.0  ;;  %v484_v36 = vmax.f32 %v480_v32, 0.0 }
 0x44b   :  { %485 = vst [vmem:[%s961_s9] sm:$0xff] %v481_v33 }
 0x44c   :  { %486 = vst [vmem:[%s961_s9 + $0x8] sm:$0xff] %v482_v34 }
 0x44d   :  { %487 = vst [vmem:[%s961_s9 + $0x10] sm:$0xff] %v483_v35 }
 0x44e   :  { %488 = vst [vmem:[%s961_s9 + $0x18] sm:$0xff] %v484_v36 }

</bundles_post_ra>
